<compile_context>
chip_gen: v6e
topology: v6e:2x2x1
jax: 0.10.0
libtpu: 0.0.40
codegen_flags: <defaults>
</compile_context>

<pallas_src>
import functools

import jax
import jax.numpy as jnp
from jax.experimental import pallas as pl
from jax.experimental.pallas import tpu as pltpu

_VOCAB_CHUNK = 128       # lanes of one-hot counts per inner step (bounds vreg use)
_ROW_TILE_CAP = 128      # K1 rows per grid step (fills an MXU pass, ~16 count vregs)
_BATCH_TILE_CAP = 256    # K2 batch rows per step (fills v6e/v7x MXU; 2 passes on v5e)


def _round_up(x, m):
    return (x + m - 1) // m * m


def _vmem_limit(bytes_est):
    # 2x headroom, never below (roughly) the scoped default, never above v7x's
    # 64 MiB physical VMEM.
    return int(min(64 << 20, max(32 << 20, 2 * bytes_est)))


def _pick_batch_tile(n):
    # Multiple of 8 sublanes, >=2 grid steps when possible (v7x has 2 TensorCores
    # sharing the "parallel" grid), capped so the MXU M dimension is filled.
    return max(8, min(_BATCH_TILE_CAP, _round_up(pl.cdiv(n, 2), 8)))


def _pick_row_tile(rows):
    # rows is a multiple of 8 (batch pre-padded).  Largest multiple-of-8 divisor
    # <= cap that still leaves >=2 grid steps.
    best = min(rows, 8)
    for cand in range(8, min(rows, _ROW_TILE_CAP) + 1, 8):
        if rows % cand == 0 and rows // cand >= 2:
            best = cand
    return best


# ---------------------------------------------------------------------------
# Kernel 1: char-embedding lookup + sum over word_len (one-hot counts -> MXU),
# vocab tiled in <=128-lane chunks, f32 accumulation, bf16 output.
#   idx_ref : (rows, W) int32     tile of N_pad*S rows
#   tbl_ref : (V, E)    float32   full char-vocab embedding table (grid invariant)
#   out_ref : (rows, E) bfloat16 ; out[r] = sum_w table[idx[r, w]]
# ---------------------------------------------------------------------------
def _embed_sum_kernel(idx_ref, tbl_ref, out_ref, *, vocab_chunks):
    ids = idx_ref[...]                                    # (rows, W)
    rows, word_len = ids.shape
    acc = jnp.zeros((rows, out_ref.shape[-1]), jnp.float32)
    for start, size in vocab_chunks:                      # static python loop
        vocab_ids = start + jax.lax.broadcasted_iota(jnp.int32, (rows, size), 1)
        counts = jnp.zeros((rows, size), jnp.float32)
        for wi in range(word_len):                        # word_len: small & static
            counts = counts + (ids[:, wi:wi + 1] == vocab_ids).astype(jnp.float32)
        acc = acc + jnp.dot(counts, tbl_ref[start:start + size, :],
                            preferred_element_type=jnp.float32)
    out_ref[...] = acc.astype(out_ref.dtype)


def embed_sum(idx2d, table):
    """(rows, W) int32, (V, E) f32 -> (rows, E) bf16 per-word embedding sums."""
    rows, word_len = idx2d.shape
    v, e = table.shape
    row_tile = _pick_row_tile(rows)
    vocab_chunks = tuple((s, min(_VOCAB_CHUNK, v - s))
                         for s in range(0, v, _VOCAB_CHUNK))
    kernel = functools.partial(_embed_sum_kernel, vocab_chunks=vocab_chunks)

    def build(single_buffer):
        if single_buffer:
            tbl_spec = pl.BlockSpec((v, e), lambda i: (0, 0),
                                    pipeline_mode=pl.Buffered(1))
        else:
            tbl_spec = pl.BlockSpec((v, e), lambda i: (0, 0))
        n_tbl_buf = 1 if single_buffer else 2
        est = (row_tile * word_len * 4 * 2            # idx blocks (double buffered)
               + v * e * 4 * n_tbl_buf                # embedding table (invariant)
               + row_tile * e * 2 * 2                 # bf16 output blocks
               + row_tile * _VOCAB_CHUNK * 4)         # in-kernel counts scratch
        return pl.pallas_call(
            kernel,
            out_shape=jax.ShapeDtypeStruct((rows, e), jnp.bfloat16),
            grid=(rows // row_tile,),
            in_specs=[pl.BlockSpec((row_tile, word_len), lambda i: (i, 0)), tbl_spec],
            out_specs=pl.BlockSpec((row_tile, e), lambda i: (i, 0)),
            compiler_params=pltpu.CompilerParams(
                dimension_semantics=("parallel",),
                vmem_limit_bytes=_vmem_limit(est)),
        )

    try:
        return build(True)(idx2d, table)
    except Exception:   # pipeline_mode=pl.Buffered(1) unsupported on this build
        return build(False)(idx2d, table)


# ---------------------------------------------------------------------------
# Kernel 2: fused conv + bias + ReLU + raw NCHW->(N,Ho,Wo,C) view + sum-over-Wo
# for ALL filters at once, as two MXU matmuls per batch tile.
#   x_ref : (Bt, S*E)            bf16 activation tile
#   g_ref : (S*E, sum C*Ho*Wo)   bf16 dense conv operator, all filters (invariant)
#   b_ref : (1,   sum C*Ho*Wo)   f32 bias broadcast to NCHW-flat order (invariant)
#   m_ref : (sum C*Ho*Wo, tot_pad) bf16 block-diag 0/1 "view + Wo-sum" matrix
#   o_ref : (Bt, tot_pad)        f32, lane-dense (tot_pad % 128 == 0)
# ---------------------------------------------------------------------------
def _conv_scramble_kernel(x_ref, g_ref, b_ref, m_ref, o_ref):
    y = jnp.dot(x_ref[...], g_ref[...], preferred_element_type=jnp.float32)
    y = jnp.maximum(y + b_ref[...], 0.0)      # bias + ReLU in f32 (no bf16 VPU on v5e)
    o_ref[...] = jnp.dot(y.astype(m_ref.dtype), m_ref[...],
                         preferred_element_type=jnp.float32)


def conv_scramble_sum(xflat, g_cat, b_cat, m_cat, *, batch_tile):
    n_pad, se = xflat.shape
    chw = g_cat.shape[1]
    tot_pad = m_cat.shape[1]

    def build(single_buffer):
        def inv_spec(shape):
            if single_buffer:
                return pl.BlockSpec(shape, lambda i: (0, 0),
                                    pipeline_mode=pl.Buffered(1))
            return pl.BlockSpec(shape, lambda i: (0, 0))
        nb = 1 if single_buffer else 2
        est = (batch_tile * se * 2 * 2            # bf16 x blocks
               + se * chw * 2 * nb                # G_cat (grid invariant)
               + chw * 4 * nb                     # bias row
               + chw * tot_pad * 2 * nb           # M_cat (grid invariant)
               + batch_tile * tot_pad * 4 * 2     # f32 output blocks
               + batch_tile * chw * 4)            # in-kernel f32 intermediate y
        return pl.pallas_call(
            _conv_scramble_kernel,
            out_shape=jax.ShapeDtypeStruct((n_pad, tot_pad), jnp.float32),
            grid=(n_pad // batch_tile,),
            in_specs=[pl.BlockSpec((batch_tile, se), lambda i: (i, 0)),
                      inv_spec((se, chw)),
                      inv_spec((1, chw)),
                      inv_spec((chw, tot_pad))],
            out_specs=pl.BlockSpec((batch_tile, tot_pad), lambda i: (i, 0)),
            compiler_params=pltpu.CompilerParams(
                dimension_semantics=("parallel",),
                vmem_limit_bytes=_vmem_limit(est)),
        )

    try:
        return build(True)(xflat, g_cat, b_cat, m_cat)
    except Exception:   # pipeline_mode=pl.Buffered(1) unsupported on this build
        return build(False)(xflat, g_cat, b_cat, m_cat)


# ---------------------------------------------------------------------------
# Parameter preprocessing (plain JAX, done once per set of conv weights).
# ---------------------------------------------------------------------------
def _conv_as_dense_operator(wgt, s, e):
    """(C,1,fh,fw) conv weights -> G (S*E, C*Ho*Wo) with
       G[s*E+e, c*Ho*Wo + h*Wo + w] = wgt[c,0,s-h,e-w] (valid conv taps), else 0."""
    c, _, fh, fw = wgt.shape
    ho, wo = s - fh + 1, e - fw + 1
    ih = (jnp.arange(s)[:, None, None] ==
          (jnp.arange(ho)[None, :, None] + jnp.arange(fh)[None, None, :])
          ).astype(jnp.float32)                              # (S, Ho, fh)
    iw = (jnp.arange(e)[:, None, None] ==
          (jnp.arange(wo)[None, :, None] + jnp.arange(fw)[None, None, :])
          ).astype(jnp.float32)                              # (E, Wo, fw)
    g = jnp.einsum('shp,ewq,cpq->sechw', ih, iw, wgt[:, 0])  # (S, E, C, Ho, Wo)
    return g.reshape(s * e, c * ho * wo)


def _view_sum_matrix(c, ho, wo):
    """0/1 matrix (C*Ho*Wo, Ho*C): NCHW-flat index f contributes to column
       (f // (Wo*C)) * C + (f % C)  — i.e. PyTorch's raw .view(N,Ho,Wo,C) followed
       by sum over axis 2."""
    f = jnp.arange(c * ho * wo)
    j = jnp.arange(ho * c)
    m = ((f[:, None] // (wo * c) == j[None, :] // c) &
         (f[:, None] % c == j[None, :] % c))
    return m.astype(jnp.float32)


# ---------------------------------------------------------------------------
# Full forward (matches CharEmbedding.forward semantics, eval mode).
#   char_idx : (N, sentence_len, word_len) int32
#   returns  : (N, sum_i (sentence_len - fh_i + 1), out_chs) float32
# ---------------------------------------------------------------------------
def char_embedding_forward(char_idx, emb_table, conv_weights, conv_biases, filters):
    n, s, wl = char_idx.shape
    v, e = emb_table.shape
    c = conv_weights[0].shape[0]

    # Pad the batch up front (char id 0 is a valid index; padded rows are cropped
    # only at the very end) so there is no mid-pipeline slice of the intermediate.
    bt = _pick_batch_tile(n)
    n_pad = _round_up(n, bt)
    if n_pad != n:
        char_idx = jnp.pad(char_idx, ((0, n_pad - n), (0, 0), (0, 0)))

    # Stage 1 (Pallas K1): embedding lookup + sum over word_len -> bf16.
    summed = embed_sum(char_idx.reshape(n_pad * s, wl), emb_table)    # (N_pad*S, E) bf16
    xflat = summed.reshape(n_pad, s * e)                              # free row-major reshape

    # Parameter preprocessing: conv as a dense operator, the module's raw
    # NCHW->(N,Ho,Wo,C) view + sum-over-Wo as a 0/1 matrix; all filters fused
    # column-wise, output columns padded to a multiple of 128.
    # TODO(synk): for production BiDAF sizes (large S, C) replace the dense G_cat
    # with an im2col-over-height matmul (or tile its columns on an 'arbitrary'
    # grid axis) so the operator fits v7x's 64 MiB VMEM.
    gs, bmaps, ms, ho_list = [], [], [], []
    for (fh, fw), wgt, bias in zip(filters, conv_weights, conv_biases):
        ho, wo = s - fh + 1, e - fw + 1
        gs.append(_conv_as_dense_operator(wgt, s, e))                 # (S*E, C*Ho*Wo)
        bmaps.append(jnp.broadcast_to(bias[:, None, None],
                                      (c, ho, wo)).reshape(1, c * ho * wo))
        ms.append(_view_sum_matrix(c, ho, wo))                        # (C*Ho*Wo, Ho*C)
        ho_list.append(ho)
    sum_ho = sum(ho_list)
    tot = sum_ho * c
    tot_pad = _round_up(tot, 128)

    g_cat = jnp.concatenate(gs, axis=1).astype(jnp.bfloat16)          # (S*E, sumCHW)
    b_cat = jnp.concatenate(bmaps, axis=1).astype(jnp.float32)        # (1, sumCHW)
    chw_tot = g_cat.shape[1]
    m_cat = jnp.zeros((chw_tot, tot_pad), jnp.float32)                # block-diagonal
    r0 = c0 = 0
    for m_i in ms:
        m_cat = m_cat.at[r0:r0 + m_i.shape[0], c0:c0 + m_i.shape[1]].set(m_i)
        r0 += m_i.shape[0]
        c0 += m_i.shape[1]
    m_cat = m_cat.astype(jnp.bfloat16)

    # Stage 2 (Pallas K2): batch-tiled fused conv + bias + ReLU + view + Wo-sum.
    out_pad = conv_scramble_sum(xflat, g_cat, b_cat, m_cat, batch_tile=bt)  # (N_pad, tot_pad)

    # TODO(synk): nn.Dropout(0.2) is identity in eval-mode forward; train dropout omitted.
    return out_pad[:, :tot].reshape(n_pad, sum_ho, c)[:n]


# ---------------------------------------------------------------------------
# Pure-JAX f32 reference for validation (same semantics incl. the raw NCHW view).
# ---------------------------------------------------------------------------
def reference_forward(char_idx, emb_table, conv_weights, conv_biases, filters):
    n, s, wl = char_idx.shape
    emb = emb_table[char_idx]                 # (N, S, W, E)
    summed = jnp.sum(emb, axis=2)             # (N, S, E)
    x4 = summed[:, None, :, :]                # NCHW, C=1
    pieces = []
    for (fh, fw), wgt, bias in zip(filters, conv_weights, conv_biases):
        c = wgt.shape[0]
        y = jax.lax.conv_general_dilated(
            x4, wgt, window_strides=(1, 1), padding="VALID",
            dimension_numbers=("NCHW", "OIHW", "NCHW"))
        y = jnp.maximum(y + bias[None, :, None, None], 0.0)
        ho, wo = y.shape[2], y.shape[3]
        z = jnp.reshape(y, (n, ho, wo, c))    # same raw view as PyTorch
        pieces.append(jnp.sum(z, axis=2))
    return jnp.concatenate(pieces, axis=1)


if __name__ == "__main__":
    # Small config consistent with the module's forward.
    N, S, W = 2, 8, 6          # batch, sentence_len, word_len
    V, E = 32, 16              # vocab_size_c, c_embd_size
    OUT_CHS = 8
    FILTERS = ((2, 2), (3, 3))

    key = jax.random.PRNGKey(0)
    keys = jax.random.split(key, 2 + 2 * len(FILTERS))
    k_idx, k_emb, k_conv = keys[0], keys[1], keys[2:]

    char_idx = jax.random.randint(k_idx, (N, S, W), 0, V, dtype=jnp.int32)
    emb_table = jax.random.normal(k_emb, (V, E), dtype=jnp.float32)  # nn.Embedding ~ N(0,1)

    conv_weights, conv_biases = [], []
    for fi, (fh, fw) in enumerate(FILTERS):
        bound = 1.0 / (fh * fw) ** 0.5     # Conv2d default uniform bound (fan_in = 1*fh*fw)
        conv_weights.append(jax.random.uniform(
            k_conv[2 * fi], (OUT_CHS, 1, fh, fw), jnp.float32, -bound, bound))
        conv_biases.append(jax.random.uniform(
            k_conv[2 * fi + 1], (OUT_CHS,), jnp.float32, -bound, bound))

    out = char_embedding_forward(char_idx, emb_table, conv_weights, conv_biases, FILTERS)
    out = jax.block_until_ready(out)

    ref = reference_forward(char_idx, emb_table, conv_weights, conv_biases, FILTERS)
    assert out.shape == ref.shape == (N, sum(S - fh + 1 for fh, _ in FILTERS), OUT_CHS), (
        out.shape, ref.shape)
    # bf16 operands (f32 accumulation) vs. f32 reference -> loosened tolerance,
    # per the perf-review correctness note.
    err = float(jnp.max(jnp.abs(out - ref)))
    assert jnp.allclose(out, ref, rtol=5e-2, atol=2e-1), err
    print("KERNEL_OK")
</pallas_src>

<mosaic_0001>
module attributes {stable_mosaic.version = 11 : i64} {
  func.func @_embed_sum_kernel(%arg0: i32, %arg1: memref<32x6xi32, #tpu.memory_space<vmem>>, %arg2: memref<32x16xf32, #tpu.memory_space<vmem>>, %arg3: memref<32x16xbf16, #tpu.memory_space<vmem>>) attributes {dimension_semantics = [#tpu.dimension_semantics<parallel>], iteration_bounds = array<i64: 2>, scalar_prefetch = 0 : i64, scratch_operands = 0 : i64, tpu.core_type = #tpu.core_type<tc>, window_params = [{transform_indices = @transform_0, window_bounds = array<i64: 32, 6>}, {pipeline_mode = #tpu.pipeline_mode<synchronous>, transform_indices = @transform_1, window_bounds = array<i64: 32, 16>}, {transform_indices = @transform_2, window_bounds = array<i64: 32, 16>}]} {
    %c0 = arith.constant 0 : index
    %c0_0 = arith.constant 0 : index
    %0 = vector.load %arg1[%c0, %c0_0] : memref<32x6xi32, #tpu.memory_space<vmem>>, vector<32x6xi32>
    %cst = arith.constant 0.000000e+00 : f32
    %1 = vector.broadcast %cst : f32 to vector<32x16xf32>
    %2 = tpu.iota {dimensions = array<i32: 1>} : vector<32x32xi32>
    %c0_i32 = arith.constant 0 : i32
    %3 = vector.broadcast %c0_i32 : i32 to vector<32x32xi32>
    %4 = arith.addi %3, %2 : vector<32x32xi32>
    %cst_1 = arith.constant 0.000000e+00 : f32
    %5 = vector.broadcast %cst_1 : f32 to vector<32x32xf32>
    %6 = vector.extract_strided_slice %0 {offsets = [0, 0], sizes = [32, 1], strides = [1, 1]} : vector<32x6xi32> to vector<32x1xi32>
    %7 = vector.broadcast %6 : vector<32x1xi32> to vector<32x32xi32>
    %8 = arith.cmpi eq, %7, %4 : vector<32x32xi32>
    %9 = arith.extui %8 : vector<32x32xi1> to vector<32x32xi32>
    %10 = arith.sitofp %9 : vector<32x32xi32> to vector<32x32xf32>
    %11 = arith.addf %5, %10 : vector<32x32xf32>
    %12 = vector.extract_strided_slice %0 {offsets = [0, 1], sizes = [32, 1], strides = [1, 1]} : vector<32x6xi32> to vector<32x1xi32>
    %13 = vector.broadcast %12 : vector<32x1xi32> to vector<32x32xi32>
    %14 = arith.cmpi eq, %13, %4 : vector<32x32xi32>
    %15 = arith.extui %14 : vector<32x32xi1> to vector<32x32xi32>
    %16 = arith.sitofp %15 : vector<32x32xi32> to vector<32x32xf32>
    %17 = arith.addf %11, %16 : vector<32x32xf32>
    %18 = vector.extract_strided_slice %0 {offsets = [0, 2], sizes = [32, 1], strides = [1, 1]} : vector<32x6xi32> to vector<32x1xi32>
    %19 = vector.broadcast %18 : vector<32x1xi32> to vector<32x32xi32>
    %20 = arith.cmpi eq, %19, %4 : vector<32x32xi32>
    %21 = arith.extui %20 : vector<32x32xi1> to vector<32x32xi32>
    %22 = arith.sitofp %21 : vector<32x32xi32> to vector<32x32xf32>
    %23 = arith.addf %17, %22 : vector<32x32xf32>
    %24 = vector.extract_strided_slice %0 {offsets = [0, 3], sizes = [32, 1], strides = [1, 1]} : vector<32x6xi32> to vector<32x1xi32>
    %25 = vector.broadcast %24 : vector<32x1xi32> to vector<32x32xi32>
    %26 = arith.cmpi eq, %25, %4 : vector<32x32xi32>
    %27 = arith.extui %26 : vector<32x32xi1> to vector<32x32xi32>
    %28 = arith.sitofp %27 : vector<32x32xi32> to vector<32x32xf32>
    %29 = arith.addf %23, %28 : vector<32x32xf32>
    %30 = vector.extract_strided_slice %0 {offsets = [0, 4], sizes = [32, 1], strides = [1, 1]} : vector<32x6xi32> to vector<32x1xi32>
    %31 = vector.broadcast %30 : vector<32x1xi32> to vector<32x32xi32>
    %32 = arith.cmpi eq, %31, %4 : vector<32x32xi32>
    %33 = arith.extui %32 : vector<32x32xi1> to vector<32x32xi32>
    %34 = arith.sitofp %33 : vector<32x32xi32> to vector<32x32xf32>
    %35 = arith.addf %29, %34 : vector<32x32xf32>
    %36 = vector.extract_strided_slice %0 {offsets = [0, 5], sizes = [32, 1], strides = [1, 1]} : vector<32x6xi32> to vector<32x1xi32>
    %37 = vector.broadcast %36 : vector<32x1xi32> to vector<32x32xi32>
    %38 = arith.cmpi eq, %37, %4 : vector<32x32xi32>
    %39 = arith.extui %38 : vector<32x32xi1> to vector<32x32xi32>
    %40 = arith.sitofp %39 : vector<32x32xi32> to vector<32x32xf32>
    %41 = arith.addf %35, %40 : vector<32x32xf32>
    %c0_2 = arith.constant 0 : index
    %c0_3 = arith.constant 0 : index
    %42 = vector.load %arg2[%c0_2, %c0_3] : memref<32x16xf32, #tpu.memory_space<vmem>>, vector<32x16xf32>
    %cst_4 = arith.constant dense<0.000000e+00> : vector<32x16xf32>
    %43 = tpu.matmul %41, %42, %cst_4 {dimension_numbers = #tpu.dot_dimension_numbers<[1], [0], [0], [1], [0, 0, 1, 1], [], []>} : vector<32x32xf32>, vector<32x16xf32>, vector<32x16xf32> -> vector<32x16xf32>
    %44 = arith.addf %1, %43 : vector<32x16xf32>
    %45 = arith.truncf %44 : vector<32x16xf32> to vector<32x16xbf16>
    %c0_5 = arith.constant 0 : index
    %c0_6 = arith.constant 0 : index
    %46 = vector.load %arg3[%c0_5, %c0_6] : memref<32x16xbf16, #tpu.memory_space<vmem>>, vector<32x16xbf16>
    tpu.vector_store %arg3[%c0_5, %c0_6], %45 {strides = array<i32>} : memref<32x16xbf16, #tpu.memory_space<vmem>>, vector<32x16xbf16>,
    return
  }
  func.func @transform_0(%arg0: i32) -> (i32, i32) {
    %c0_i32 = arith.constant 0 : i32
    %c0_i32_0 = arith.constant 0 : i32
    return %arg0, %c0_i32 : i32, i32
  }
  func.func @transform_1(%arg0: i32) -> (i32, i32) {
    %c0_i32 = arith.constant 0 : i32
    %c0_i32_0 = arith.constant 0 : i32
    %c0_i32_1 = arith.constant 0 : i32
    return %c0_i32, %c0_i32_0 : i32, i32
  }
  func.func @transform_2(%arg0: i32) -> (i32, i32) {
    %c0_i32 = arith.constant 0 : i32
    %c0_i32_0 = arith.constant 0 : i32
    return %arg0, %c0_i32 : i32, i32
  }
}

module attributes {stable_mosaic.version = 11 : i64} {
  func.func @_embed_sum_kernel(%arg0: i32, %arg1: memref<32x6xi32, #tpu.memory_space<vmem>>, %arg2: memref<32x16xf32, #tpu.memory_space<vmem>>, %arg3: memref<32x16xbf16, #tpu.memory_space<vmem>>) attributes {dimension_semantics = [#tpu.dimension_semantics<parallel>], iteration_bounds = array<i64: 2>, scalar_prefetch = 0 : i64, scratch_operands = 0 : i64, tpu.core_type = #tpu.core_type<tc>, window_params = [{transform_indices = @transform_0, window_bounds = array<i64: 32, 6>}, {pipeline_mode = #tpu.pipeline_mode<synchronous>, transform_indices = @transform_1, window_bounds = array<i64: 32, 16>}, {transform_indices = @transform_2, window_bounds = array<i64: 32, 16>}]} {
    %c0 = arith.constant 0 : index
    %c0_0 = arith.constant 0 : index
    %0 = vector.load %arg1[%c0, %c0_0] : memref<32x6xi32, #tpu.memory_space<vmem>>, vector<32x6xi32>
    %cst = arith.constant 0.000000e+00 : f32
    %1 = vector.broadcast %cst : f32 to vector<32x16xf32>
    %2 = tpu.iota {dimensions = array<i32: 1>} : vector<32x32xi32>
    %c0_i32 = arith.constant 0 : i32
    %3 = vector.broadcast %c0_i32 : i32 to vector<32x32xi32>
    %4 = arith.addi %3, %2 : vector<32x32xi32>
    %cst_1 = arith.constant 0.000000e+00 : f32
    %5 = vector.broadcast %cst_1 : f32 to vector<32x32xf32>
    %6 = vector.extract_strided_slice %0 {offsets = [0, 0], sizes = [32, 1], strides = [1, 1]} : vector<32x6xi32> to vector<32x1xi32>
    %7 = vector.broadcast %6 : vector<32x1xi32> to vector<32x32xi32>
    %8 = arith.cmpi eq, %7, %4 : vector<32x32xi32>
    %9 = arith.extui %8 : vector<32x32xi1> to vector<32x32xi32>
    %10 = arith.sitofp %9 : vector<32x32xi32> to vector<32x32xf32>
    %11 = arith.addf %5, %10 : vector<32x32xf32>
    %12 = vector.extract_strided_slice %0 {offsets = [0, 1], sizes = [32, 1], strides = [1, 1]} : vector<32x6xi32> to vector<32x1xi32>
    %13 = vector.broadcast %12 : vector<32x1xi32> to vector<32x32xi32>
    %14 = arith.cmpi eq, %13, %4 : vector<32x32xi32>
    %15 = arith.extui %14 : vector<32x32xi1> to vector<32x32xi32>
    %16 = arith.sitofp %15 : vector<32x32xi32> to vector<32x32xf32>
    %17 = arith.addf %11, %16 : vector<32x32xf32>
    %18 = vector.extract_strided_slice %0 {offsets = [0, 2], sizes = [32, 1], strides = [1, 1]} : vector<32x6xi32> to vector<32x1xi32>
    %19 = vector.broadcast %18 : vector<32x1xi32> to vector<32x32xi32>
    %20 = arith.cmpi eq, %19, %4 : vector<32x32xi32>
    %21 = arith.extui %20 : vector<32x32xi1> to vector<32x32xi32>
    %22 = arith.sitofp %21 : vector<32x32xi32> to vector<32x32xf32>
    %23 = arith.addf %17, %22 : vector<32x32xf32>
    %24 = vector.extract_strided_slice %0 {offsets = [0, 3], sizes = [32, 1], strides = [1, 1]} : vector<32x6xi32> to vector<32x1xi32>
    %25 = vector.broadcast %24 : vector<32x1xi32> to vector<32x32xi32>
    %26 = arith.cmpi eq, %25, %4 : vector<32x32xi32>
    %27 = arith.extui %26 : vector<32x32xi1> to vector<32x32xi32>
    %28 = arith.sitofp %27 : vector<32x32xi32> to vector<32x32xf32>
    %29 = arith.addf %23, %28 : vector<32x32xf32>
    %30 = vector.extract_strided_slice %0 {offsets = [0, 4], sizes = [32, 1], strides = [1, 1]} : vector<32x6xi32> to vector<32x1xi32>
    %31 = vector.broadcast %30 : vector<32x1xi32> to vector<32x32xi32>
    %32 = arith.cmpi eq, %31, %4 : vector<32x32xi32>
    %33 = arith.extui %32 : vector<32x32xi1> to vector<32x32xi32>
    %34 = arith.sitofp %33 : vector<32x32xi32> to vector<32x32xf32>
    %35 = arith.addf %29, %34 : vector<32x32xf32>
    %36 = vector.extract_strided_slice %0 {offsets = [0, 5], sizes = [32, 1], strides = [1, 1]} : vector<32x6xi32> to vector<32x1xi32>
    %37 = vector.broadcast %36 : vector<32x1xi32> to vector<32x32xi32>
    %38 = arith.cmpi eq, %37, %4 : vector<32x32xi32>
    %39 = arith.extui %38 : vector<32x32xi1> to vector<32x32xi32>
    %40 = arith.sitofp %39 : vector<32x32xi32> to vector<32x32xf32>
    %41 = arith.addf %35, %40 : vector<32x32xf32>
    %c0_2 = arith.constant 0 : index
    %c0_3 = arith.constant 0 : index
    %42 = vector.load %arg2[%c0_2, %c0_3] : memref<32x16xf32, #tpu.memory_space<vmem>>, vector<32x16xf32>
    %cst_4 = arith.constant dense<0.000000e+00> : vector<32x16xf32>
    %43 = tpu.matmul %41, %42, %cst_4 {dimension_numbers = #tpu.dot_dimension_numbers<[1], [0], [0], [1], [0, 0, 1, 1], [], []>} : vector<32x32xf32>, vector<32x16xf32>, vector<32x16xf32> -> vector<32x16xf32>
    %44 = arith.addf %1, %43 : vector<32x16xf32>
    %45 = arith.truncf %44 : vector<32x16xf32> to vector<32x16xbf16>
    %c0_5 = arith.constant 0 : index
    %c0_6 = arith.constant 0 : index
    %46 = vector.load %arg3[%c0_5, %c0_6] : memref<32x16xbf16, #tpu.memory_space<vmem>>, vector<32x16xbf16>
    tpu.vector_store %arg3[%c0_5, %c0_6], %45 {strides = array<i32>} : memref<32x16xbf16, #tpu.memory_space<vmem>>, vector<32x16xbf16>,
    return
  }
  func.func @transform_0(%arg0: i32) -> (i32, i32) {
    %c0_i32 = arith.constant 0 : i32
    %c0_i32_0 = arith.constant 0 : i32
    return %arg0, %c0_i32 : i32, i32
  }
  func.func @transform_1(%arg0: i32) -> (i32, i32) {
    %c0_i32 = arith.constant 0 : i32
    %c0_i32_0 = arith.constant 0 : i32
    %c0_i32_1 = arith.constant 0 : i32
    return %c0_i32, %c0_i32_0 : i32, i32
  }
  func.func @transform_2(%arg0: i32) -> (i32, i32) {
    %c0_i32 = arith.constant 0 : i32
    %c0_i32_0 = arith.constant 0 : i32
    return %arg0, %c0_i32 : i32, i32
  }
}

</mosaic_0001>

<bundles_post_ra>
// kernel: tpu_custom_call.1
= control target key start
LH: loop header
LB: loop body
LE: loop exit
PB: predicated region body
PF: predicated region fallthrough
CT: control target
= control target key end

     0   :  { %s641_s9 = smov 0   ;;  %s737_s0 = inlined_call_operand.vmem [shape: s32[64,6], index: 0, kind: input, shape index: {}]   ;;  %s738_s1 = inlined_call_operand.vmem [shape: f32[32,16], index: 1, kind: input, shape index: {}]   ;;  %s739_s2 = inlined_call_operand.vmem [shape: bf16[64,16], index: 2, kind: output, shape index: {}]  }
   0x1 LB: > { %s500_s10 = sadd.s32 4294967295, %s617_s9   ;;  %p504_p0 = scmp.ge.s32.totalorder %s617_s9, 1  ;;  %s617_s9 = sphi %s641_s9, %s12_s9  }
   0x2   : > { %p113_p1 = scmp.lt.s32.totalorder %s617_s9, 3 }
   0x4   : > { %p114_p2 = pnand %p504_p0, %p113_p1 }
   0x5   : > { %s505_s11 = sshll.u32 (!%p114_p2), %s500_s10, 2 }
   0x6   : > { %117 = sbr.rel (%p114_p2) target bundleno = 409 (0x199), region = 28  ;;  %p136_p3 = scmp.lt.s32.totalorder (!%p114_p2), %s505_s11, 7 }
   0xb   : > { %v619_v0 = vmov 1   ;;  %v620_v1 = vmov 0   ;;  %s741_s11 = smov (!%p136_p3, %s505_s11), 7  ;;  %v621_v6 = vmov 2   ;;  %v622_v7 = vmov 3   ;;  %v324_v10 = vld [vmem:[%s738_s1 + $0x18] sm:$0xff] }
   0xc   : > { %592 = vset.pattern.permute.xlu0 %v619_v0  ;;  %593 = vset.pattern.permute.xlu1 %v620_v1  ;;  %s506_s12 = sshll.u32 %s741_s11, 3  ;;  %v623_v8 = vmov 4   ;;  %v624_v9 = vmov 5   ;;  %v323_v11 = vld [vmem:[%s738_s1 + $0x10] sm:$0xff]  ;;  %v322_v12 = vld [vmem:[%s738_s1 + $0x8] sm:$0xff]  ;;  %v321_v13 = vld [vmem:[%s738_s1] sm:$0xff]  ;;  %v151_v26 = vlaneseq }
   0xd   : > { %s139_s15 = scalar_lea.vmem %s737_s0, %s506_s12  ;;  %555 = vmatprep.subr.mxu0 %v324_v10  ;;  %569 = vmatprep.subr.mxu1 %v324_v10  ;;  %v625_v32 = vmov 0.0   ;;  %s508_s24 = sshll.u32 %s741_s11, 2 }
   0xe   : > { %v148_v2 = vld [vmem:[%s139_s15 + $0x8] sm:$0xff]  ;;  %v147_v3 = vld [vmem:[%s139_s15] sm:$0xff]  ;;  %v149_v4 = vld [vmem:[%s139_s15 + $0x10] sm:$0xff]  ;;  %556 = vmatpush3.msra.mxu0 %v324_v10  ;;  %573 = vmatpush3.msra.mxu1 %v324_v10  ;;  %v671_v29 = vand.u32 127, %v151_v26  ;;  %s145_s27 = scalar_lea.vmem %s739_s2, %s508_s24 }
   0xf   : > { %157 = vperm.xlu1 %593, %v148_v2   ;;  %182 = vperm.xlu0 %592, %v147_v3   ;;  %v150_v5 = vld [vmem:[%s139_s15 + $0x18] sm:$0xff] }
  0x10   : > { %557 = vmatprep.subr.mxu0 %v323_v11  ;;  %570 = vmatprep.subr.mxu1 %v323_v11 }
  0x11   : > { %558 = vmatpush3.msra.mxu0 %v323_v11  ;;  %574 = vmatpush3.msra.mxu1 %v323_v11 }
  0x12   : > { %559 = vmatprep.subr.mxu0 %v322_v12  ;;  %571 = vmatprep.subr.mxu1 %v322_v12 }
  0x13   : > { %594 = vset.pattern.permute.xlu1 %v619_v0  ;;  %188 = vperm.xlu0 %592, %v149_v4  }
  0x14   : > { %185 = vperm.xlu1 %594, %v148_v2   ;;  %560 = vmatpush3.msra.mxu0 %v322_v12 }
  0x15   : > { %561 = vmatprep.subr.mxu0 %v321_v13  ;;  %575 = vmatpush3.msra.mxu1 %v322_v12 }
  0x16   : > { %562 = vmatpush3.msra.mxu0 %v321_v13  ;;  %572 = vmatprep.subr.mxu1 %v321_v13 }
  0x17   : > { %596 = vset.pattern.permute.xlu0 %v620_v1  ;;  %576 = vmatpush3.msra.mxu1 %v321_v13 }
  0x18   : > { %595 = vset.pattern.permute.xlu1 %v620_v1  ;;  %154 = vperm.xlu0 %596, %v147_v3  }
  0x19   : > { %160 = vperm.xlu1 %595, %v149_v4  }
  0x1c   : > { %163 = vperm.xlu0 %596, %v150_v5  }
  0x1d   : > { %597 = vset.pattern.permute.xlu1 %v621_v6 }
  0x1e   : > { %210 = vperm.xlu1 %597, %v147_v3  }
  0x20   : > { %600 = vset.pattern.permute.xlu0 %v621_v6 }
  0x21   : > { %216 = vperm.xlu0 %600, %v149_v4  }
  0x22   : > { %598 = vset.pattern.permute.xlu1 %v619_v0 }
  0x23   : > { %191 = vperm.xlu1 %598, %v150_v5  }
  0x25   : > { %603 = vset.pattern.permute.xlu0 %v622_v7 }
  0x26   : > { %241 = vperm.xlu0 %603, %v148_v2  }
  0x27   : > { %599 = vset.pattern.permute.xlu1 %v621_v6 }
  0x28   : > { %213 = vperm.xlu1 %599, %v148_v2  }
  0x2a   : > { %247 = vperm.xlu0 %603, %v150_v5  }
  0x2c   : > { %601 = vset.pattern.permute.xlu1 %v622_v7 }
  0x2d   : > { %238 = vperm.xlu1 %601, %v147_v3  }
  0x2e   : > { %606 = vset.pattern.permute.xlu0 %v623_v8 }
  0x2f   : > { %272 = vperm.xlu0 %606, %v149_v4  }
  0x31   : > { %602 = vset.pattern.permute.xlu1 %v621_v6 }
  0x32   : > { %219 = vperm.xlu1 %602, %v150_v5  }
  0x33   : > { %609 = vset.pattern.permute.xlu0 %v624_v9 }
  0x34   : > { %297 = vperm.xlu0 %609, %v148_v2  }
  0x36   : > { %604 = vset.pattern.permute.xlu1 %v622_v7 }
  0x37   : > { %244 = vperm.xlu1 %604, %v149_v4  }
  0x3b   : > { %605 = vset.pattern.permute.xlu1 %v623_v8 }
  0x3c   : > { %266 = vperm.xlu1 %605, %v147_v3  }
  0x40   : > { %269 = vperm.xlu1 %605, %v148_v2  }
  0x44   : > { %607 = vset.pattern.permute.xlu1 %v624_v9 }
  0x45   : > { %294 = vperm.xlu1 %607, %v147_v3  }
  0x49   : > { %608 = vset.pattern.permute.xlu1 %v623_v8 }
  0x4a   : > { %275 = vperm.xlu1 %608, %v150_v5  }
  0x4e   : > { %610 = vset.pattern.permute.xlu1 %v624_v9 }
  0x4f   : > { %300 = vperm.xlu1 %610, %v149_v4  }
  0x53   : > { %303 = vperm.xlu1 %610, %v150_v5  }
  0x8a   : > { %v158_v14 = vpop.permute.xlu1 %157  ;;  %v183_v16 = vpop.permute.xlu0 %182 }
  0x8b   : > { %vm193_vm1 = vcmp.eq.s32.totalorder %v183_v16, %v671_v29  ;;  %vm166_vm3 = vcmp.eq.s32.totalorder %v158_v14, %v671_v29 }
  0x8c   : > { %v513_v34 = vsel %vm193_vm1, 1.0, %v625_v32  ;;  %v510_v36 = vsel %vm166_vm3, 1.0, %v625_v32 }
  0x8e   : > { %v189_v18 = vpop.permute.xlu0 %188 }
  0x8f   : > { %v186_v15 = vpop.permute.xlu1 %185  ;;  %vm195_vm9 = vcmp.eq.s32.totalorder %v189_v18, %v671_v29 }
  0x90   : > { %vm194_vm0 = vcmp.eq.s32.totalorder %v186_v15, %v671_v29  ;;  %v515_v52 = vsel %vm195_vm9, 1.0, %v625_v32  ;;  %vm439_vm9 = vcmask 125952  }
  0x91   : > { %v514_v33 = vsel %vm194_vm0, 1.0, %v625_v32 }
  0x92   : > { %v206_v40 = vadd.f32 %v514_v33, %v510_v36 }
  0x93   : > { %v155_v20 = vpop.permute.xlu0 %154 }
  0x94   : > { %v161_v17 = vpop.permute.xlu1 %160  ;;  %vm165_vm2 = vcmp.eq.s32.totalorder %v155_v20, %v671_v29 }
  0x95   : > { %v509_v35 = vsel %vm165_vm2, 1.0, %v625_v32  ;;  %vm167_vm11 = vcmp.eq.s32.totalorder %v161_v17, %v671_v29  ;;  %vm325_vm2 = vcmask 261120  }
  0x96   : > { %v205_v41 = vadd.f32 %v513_v34, %v509_v35  ;;  %v511_v54 = vsel %vm167_vm11, 1.0, %v625_v32 }
  0x97   : > { %v164_v22 = vpop.permute.xlu0 %163  ;;  %v207_v61 = vadd.f32 %v515_v52, %v511_v54 }
  0x98   : > { %vm168_vm14 = vcmp.eq.s32.totalorder %v164_v22, %v671_v29 }
  0x99   : > { %v211_v19 = vpop.permute.xlu1 %210  ;;  %v512_v63 = vsel %vm168_vm14, 1.0, %v625_v32 }
  0x9a   : > { %vm221_vm5 = vcmp.eq.s32.totalorder %v211_v19, %v671_v29 }
  0x9b   : > { %v517_v42 = vsel %vm221_vm5, 1.0, %v625_v32 }
  0x9c   : > { %v217_v25 = vpop.permute.xlu0 %216  ;;  %v233_v48 = vadd.f32 %v517_v42, %v205_v41 }
  0x9d   : > { %vm223_vm13 = vcmp.eq.s32.totalorder %v217_v25, %v671_v29 }
  0x9e   : > { %v667_v21 = vpop.permute.xlu1 %191  ;;  %v519_v59 = vsel %vm223_vm13, 1.0, %v625_v32 }
  0x9f   : > { %vm196_vm15 = vcmp.eq.s32.totalorder %v667_v21, %v671_v29  ;;  %v235_v3 = vadd.f32 %v519_v59, %v207_v61 }
  0xa0   : > { %v516_v0 = vsel %vm196_vm15, 1.0, %v625_v32 }
  0xa1   : > { %v242_v27 = vpop.permute.xlu0 %241  ;;  %v208_v6 = vadd.f32 %v516_v0, %v512_v63 }
  0xa2   : > { %vm250_vm6 = vcmp.eq.s32.totalorder %v242_v27, %v671_v29 }
  0xa3   : > { %v214_v23 = vpop.permute.xlu1 %213  ;;  %v522_v44 = vsel %vm250_vm6, 1.0, %v625_v32 }
  0xa4   : > { %vm222_vm4 = vcmp.eq.s32.totalorder %v214_v23, %v671_v29 }
  0xa5   : > { %v673_v30 = vpop.permute.xlu0 %247  ;;  %v518_v37 = vsel %vm222_vm4, 1.0, %v625_v32 }
  0xa6   : > { %v234_v43 = vadd.f32 %v518_v37, %v206_v40  ;;  %vm252_vm5 = vcmp.eq.s32.totalorder %v673_v30, %v671_v29 }
  0xa7   : > { %v524_v10 = vsel %vm252_vm5, 1.0, %v625_v32 }
  0xa8   : > { %v239_v24 = vpop.permute.xlu1 %238  ;;  %v262_v50 = vadd.f32 %v522_v44, %v234_v43 }
  0xa9   : > { %vm249_vm7 = vcmp.eq.s32.totalorder %v239_v24, %v671_v29 }
  0xaa   : > { %v273_v38 = vpop.permute.xlu0 %272  ;;  %v521_v47 = vsel %vm249_vm7, 1.0, %v625_v32 }
  0xab   : > { %v261_v53 = vadd.f32 %v521_v47, %v233_v48  ;;  %vm279_vm4 = vcmp.eq.s32.totalorder %v273_v38, %v671_v29 }
  0xac   : > { %v527_v8 = vsel %vm279_vm4, 1.0, %v625_v32 }
  0xad   : > { %v669_v28 = vpop.permute.xlu1 %219 }
  0xae   : > { %vm224_vm3 = vcmp.eq.s32.totalorder %v669_v28, %v671_v29 }
  0xaf   : > { %v298_v46 = vpop.permute.xlu0 %297  ;;  %v520_v5 = vsel %vm224_vm3, 1.0, %v625_v32 }
  0xb0   : > { %vm306_vm12 = vcmp.eq.s32.totalorder %v298_v46, %v671_v29  ;;  %v236_v9 = vadd.f32 %v520_v5, %v208_v6 }
  0xb1   : > { %v530_v58 = vsel %vm306_vm12, 1.0, %v625_v32 }
  0xb2   : > { %v245_v31 = vpop.permute.xlu1 %244  ;;  %v264_v15 = vadd.f32 %v524_v10, %v236_v9 }
  0xb3   : > { %vm251_vm0 = vcmp.eq.s32.totalorder %v245_v31, %v671_v29 }
  0xb4   : > { %v523_v1 = vsel %vm251_vm0, 1.0, %v625_v32 }
  0xb5   : > { %v263_v7 = vadd.f32 %v523_v1, %v235_v3 }
  0xb7   : > { %v267_v39 = vpop.permute.xlu1 %266  ;;  %v291_v12 = vadd.f32 %v527_v8, %v263_v7 }
  0xb8   : > { %vm277_vm8 = vcmp.eq.s32.totalorder %v267_v39, %v671_v29 }
  0xb9   : > { %v525_v51 = vsel %vm277_vm8, 1.0, %v625_v32 }
  0xba   : > { %v289_v57 = vadd.f32 %v525_v51, %v261_v53 }
  0xbb   : > { %v270_v45 = vpop.permute.xlu1 %269 }
  0xbc   : > { %vm278_vm10 = vcmp.eq.s32.totalorder %v270_v45, %v671_v29 }
  0xbd   : > { %v526_v49 = vsel %vm278_vm10, 1.0, %v625_v32 }
  0xbe   : > { %v290_v55 = vadd.f32 %v526_v49, %v262_v50 }
  0xc0   : > { %v295_v56 = vpop.permute.xlu1 %294  ;;  %v318_v2 = vadd.f32 %v530_v58, %v290_v55 }
  0xc1   : > { %vm305_vm1 = vcmp.eq.s32.totalorder %v295_v56, %v671_v29 }
  0xc2   : > { %v529_v60 = vsel %vm305_vm1, 1.0, %v625_v32 }
  0xc3   : > { %v317_v62 = vadd.f32 %v529_v60, %v289_v57 }
  0xc5   : > { %v276_v4 = vpop.permute.xlu1 %275  ;;  %563 = vmatprep.mubr.msk.f32.mxu0 %vm325_vm2, %v317_v62 }
  0xc6   : > { %564 = vmatmul.mubr.msk.f32.vlgmr.msra.gmra.mxu0 %vm325_vm2, %v318_v2  ;;  %vm280_vm6 = vcmp.eq.s32.totalorder %v276_v4, %v671_v29 }
  0xc7   : > { %v528_v13 = vsel %vm280_vm6, 1.0, %v625_v32 }
  0xc8   : > { %v292_v18 = vadd.f32 %v528_v13, %v264_v15 }
  0xca   : > { %v301_v11 = vpop.permute.xlu1 %300 }
  0xcb   : > { %vm307_vm7 = vcmp.eq.s32.totalorder %v301_v11, %v671_v29 }
  0xcc   : > { %v531_v14 = vsel %vm307_vm7, 1.0, %v625_v32 }
  0xcd   : > { %v319_v16 = vadd.f32 %v531_v14, %v291_v12 }
  0xce   : > { %v304_v17 = vpop.permute.xlu1 %303 }
  0xcf   : > { %vm308_vm8 = vcmp.eq.s32.totalorder %v304_v17, %v671_v29  ;;  %566 = vmatprep.mubr.msk.f32.mxu1 %vm325_vm2, %v319_v16 }
  0xd0   : > { %v532_v19 = vsel %vm308_vm8, 1.0, %v625_v32 }
  0xd1   : > { %v320_v20 = vadd.f32 %v532_v19, %v292_v18 }
  0xd3   : > { %567 = vmatmul.mubr.msk.f32.vlgmr.msra.gmra.mxu1 %vm325_vm2, %v320_v20 }
 0x186   : > { %v565_v21 = vpop.f32.mrf.mxu0 }
 0x187   : > { %v544_v24 = vpack.c.bf16 %v565_v21, %v565_v21 }
 0x188   : > { %v404_v22 = vpop.f32.mrf.mxu0 }
 0x189   : > { %v543_v23 = vpack.c.bf16 %v404_v22, %v404_v22  ;;  %441 = vst.msk [vmem:[%s145_s27 + $0x4] sm:$0xf] %vm439_vm9, %v544_v24 }
 0x18b   : > { %440 = vst.msk [vmem:[%s145_s27] sm:$0xf] %vm439_vm9, %v543_v23 }
 0x193   : > { %v568_v25 = vpop.f32.mrf.mxu1 }
 0x194   : > { %v546_v28 = vpack.c.bf16 %v568_v25, %v568_v25 }
 0x195   : > { %v414_v26 = vpop.f32.mrf.mxu1 }
 0x196   : > { %v545_v27 = vpack.c.bf16 %v414_v26, %v414_v26  ;;  %443 = vst.msk [vmem:[%s145_s27 + $0xc] sm:$0xf] %vm439_vm9, %v546_v28 }
 0x198   : > { %442 = vst.msk [vmem:[%s145_s27 + $0x8] sm:$0xf] %vm439_vm9, %v545_v27 }
 0x199 PF: > { %s12_s9 = sadd.s32 1, %s617_s9  }
 0x19a   : > { %p9_p4 = scmp.ge.s32.totalorder %s12_s9, 4  }
 0x19c   :  { %11 = sbr.rel (!%p9_p4) target bundleno = 1 (0x1), region = 58 }

// kernel: tpu_custom_call.1
= control target key start
LH: loop header
LB: loop body
LE: loop exit
PB: predicated region body
PF: predicated region fallthrough
CT: control target
= control target key end

     0   :  { %s641_s9 = smov 0   ;;  %s737_s0 = inlined_call_operand.vmem [shape: s32[64,6], index: 0, kind: input, shape index: {}]   ;;  %s738_s1 = inlined_call_operand.vmem [shape: f32[32,16], index: 1, kind: input, shape index: {}]   ;;  %s739_s2 = inlined_call_operand.vmem [shape: bf16[64,16], index: 2, kind: output, shape index: {}]  }
   0x1 LB: > { %s500_s10 = sadd.s32 4294967295, %s617_s9   ;;  %p504_p0 = scmp.ge.s32.totalorder %s617_s9, 1  ;;  %s617_s9 = sphi %s641_s9, %s12_s9  }
   0x2   : > { %p113_p1 = scmp.lt.s32.totalorder %s617_s9, 3 }
   0x4   : > { %p114_p2 = pnand %p504_p0, %p113_p1 }
   0x5   : > { %s505_s11 = sshll.u32 (!%p114_p2), %s500_s10, 2 }
   0x6   : > { %117 = sbr.rel (%p114_p2) target bundleno = 409 (0x199), region = 28  ;;  %p136_p3 = scmp.lt.s32.totalorder (!%p114_p2), %s505_s11, 7 }
   0xb   : > { %v619_v0 = vmov 1   ;;  %v620_v1 = vmov 0   ;;  %s741_s11 = smov (!%p136_p3, %s505_s11), 7  ;;  %v621_v6 = vmov 2   ;;  %v622_v7 = vmov 3   ;;  %v324_v10 = vld [vmem:[%s738_s1 + $0x18] sm:$0xff] }
   0xc   : > { %592 = vset.pattern.permute.xlu0 %v619_v0  ;;  %593 = vset.pattern.permute.xlu1 %v620_v1  ;;  %s506_s12 = sshll.u32 %s741_s11, 3  ;;  %v623_v8 = vmov 4   ;;  %v624_v9 = vmov 5   ;;  %v323_v11 = vld [vmem:[%s738_s1 + $0x10] sm:$0xff]  ;;  %v322_v12 = vld [vmem:[%s738_s1 + $0x8] sm:$0xff]  ;;  %v321_v13 = vld [vmem:[%s738_s1] sm:$0xff]  ;;  %v151_v26 = vlaneseq }
   0xd   : > { %s139_s15 = scalar_lea.vmem %s737_s0, %s506_s12  ;;  %555 = vmatprep.subr.mxu0 %v324_v10  ;;  %569 = vmatprep.subr.mxu1 %v324_v10  ;;  %v625_v32 = vmov 0.0   ;;  %s508_s24 = sshll.u32 %s741_s11, 2 }
   0xe   : > { %v148_v2 = vld [vmem:[%s139_s15 + $0x8] sm:$0xff]  ;;  %v147_v3 = vld [vmem:[%s139_s15] sm:$0xff]  ;;  %v149_v4 = vld [vmem:[%s139_s15 + $0x10] sm:$0xff]  ;;  %556 = vmatpush3.msra.mxu0 %v324_v10  ;;  %573 = vmatpush3.msra.mxu1 %v324_v10  ;;  %v671_v29 = vand.u32 127, %v151_v26  ;;  %s145_s27 = scalar_lea.vmem %s739_s2, %s508_s24 }
   0xf   : > { %157 = vperm.xlu1 %593, %v148_v2   ;;  %182 = vperm.xlu0 %592, %v147_v3   ;;  %v150_v5 = vld [vmem:[%s139_s15 + $0x18] sm:$0xff] }
  0x10   : > { %557 = vmatprep.subr.mxu0 %v323_v11  ;;  %570 = vmatprep.subr.mxu1 %v323_v11 }
  0x11   : > { %558 = vmatpush3.msra.mxu0 %v323_v11  ;;  %574 = vmatpush3.msra.mxu1 %v323_v11 }
  0x12   : > { %559 = vmatprep.subr.mxu0 %v322_v12  ;;  %571 = vmatprep.subr.mxu1 %v322_v12 }
  0x13   : > { %594 = vset.pattern.permute.xlu1 %v619_v0  ;;  %188 = vperm.xlu0 %592, %v149_v4  }
  0x14   : > { %185 = vperm.xlu1 %594, %v148_v2   ;;  %560 = vmatpush3.msra.mxu0 %v322_v12 }
  0x15   : > { %561 = vmatprep.subr.mxu0 %v321_v13  ;;  %575 = vmatpush3.msra.mxu1 %v322_v12 }
  0x16   : > { %562 = vmatpush3.msra.mxu0 %v321_v13  ;;  %572 = vmatprep.subr.mxu1 %v321_v13 }
  0x17   : > { %596 = vset.pattern.permute.xlu0 %v620_v1  ;;  %576 = vmatpush3.msra.mxu1 %v321_v13 }
  0x18   : > { %595 = vset.pattern.permute.xlu1 %v620_v1  ;;  %154 = vperm.xlu0 %596, %v147_v3  }
  0x19   : > { %160 = vperm.xlu1 %595, %v149_v4  }
  0x1c   : > { %163 = vperm.xlu0 %596, %v150_v5  }
  0x1d   : > { %597 = vset.pattern.permute.xlu1 %v621_v6 }
  0x1e   : > { %210 = vperm.xlu1 %597, %v147_v3  }
  0x20   : > { %600 = vset.pattern.permute.xlu0 %v621_v6 }
  0x21   : > { %216 = vperm.xlu0 %600, %v149_v4  }
  0x22   : > { %598 = vset.pattern.permute.xlu1 %v619_v0 }
  0x23   : > { %191 = vperm.xlu1 %598, %v150_v5  }
  0x25   : > { %603 = vset.pattern.permute.xlu0 %v622_v7 }
  0x26   : > { %241 = vperm.xlu0 %603, %v148_v2  }
  0x27   : > { %599 = vset.pattern.permute.xlu1 %v621_v6 }
  0x28   : > { %213 = vperm.xlu1 %599, %v148_v2  }
  0x2a   : > { %247 = vperm.xlu0 %603, %v150_v5  }
  0x2c   : > { %601 = vset.pattern.permute.xlu1 %v622_v7 }
  0x2d   : > { %238 = vperm.xlu1 %601, %v147_v3  }
  0x2e   : > { %606 = vset.pattern.permute.xlu0 %v623_v8 }
  0x2f   : > { %272 = vperm.xlu0 %606, %v149_v4  }
  0x31   : > { %602 = vset.pattern.permute.xlu1 %v621_v6 }
  0x32   : > { %219 = vperm.xlu1 %602, %v150_v5  }
  0x33   : > { %609 = vset.pattern.permute.xlu0 %v624_v9 }
  0x34   : > { %297 = vperm.xlu0 %609, %v148_v2  }
  0x36   : > { %604 = vset.pattern.permute.xlu1 %v622_v7 }
  0x37   : > { %244 = vperm.xlu1 %604, %v149_v4  }
  0x3b   : > { %605 = vset.pattern.permute.xlu1 %v623_v8 }
  0x3c   : > { %266 = vperm.xlu1 %605, %v147_v3  }
  0x40   : > { %269 = vperm.xlu1 %605, %v148_v2  }
  0x44   : > { %607 = vset.pattern.permute.xlu1 %v624_v9 }
  0x45   : > { %294 = vperm.xlu1 %607, %v147_v3  }
  0x49   : > { %608 = vset.pattern.permute.xlu1 %v623_v8 }
  0x4a   : > { %275 = vperm.xlu1 %608, %v150_v5  }
  0x4e   : > { %610 = vset.pattern.permute.xlu1 %v624_v9 }
  0x4f   : > { %300 = vperm.xlu1 %610, %v149_v4  }
  0x53   : > { %303 = vperm.xlu1 %610, %v150_v5  }
  0x8a   : > { %v158_v14 = vpop.permute.xlu1 %157  ;;  %v183_v16 = vpop.permute.xlu0 %182 }
  0x8b   : > { %vm193_vm1 = vcmp.eq.s32.totalorder %v183_v16, %v671_v29  ;;  %vm166_vm3 = vcmp.eq.s32.totalorder %v158_v14, %v671_v29 }
  0x8c   : > { %v513_v34 = vsel %vm193_vm1, 1.0, %v625_v32  ;;  %v510_v36 = vsel %vm166_vm3, 1.0, %v625_v32 }
  0x8e   : > { %v189_v18 = vpop.permute.xlu0 %188 }
  0x8f   : > { %v186_v15 = vpop.permute.xlu1 %185  ;;  %vm195_vm9 = vcmp.eq.s32.totalorder %v189_v18, %v671_v29 }
  0x90   : > { %vm194_vm0 = vcmp.eq.s32.totalorder %v186_v15, %v671_v29  ;;  %v515_v52 = vsel %vm195_vm9, 1.0, %v625_v32  ;;  %vm439_vm9 = vcmask 125952  }
  0x91   : > { %v514_v33 = vsel %vm194_vm0, 1.0, %v625_v32 }
  0x92   : > { %v206_v40 = vadd.f32 %v514_v33, %v510_v36 }
  0x93   : > { %v155_v20 = vpop.permute.xlu0 %154 }
  0x94   : > { %v161_v17 = vpop.permute.xlu1 %160  ;;  %vm165_vm2 = vcmp.eq.s32.totalorder %v155_v20, %v671_v29 }
  0x95   : > { %v509_v35 = vsel %vm165_vm2, 1.0, %v625_v32  ;;  %vm167_vm11 = vcmp.eq.s32.totalorder %v161_v17, %v671_v29  ;;  %vm325_vm2 = vcmask 261120  }
  0x96   : > { %v205_v41 = vadd.f32 %v513_v34, %v509_v35  ;;  %v511_v54 = vsel %vm167_vm11, 1.0, %v625_v32 }
  0x97   : > { %v164_v22 = vpop.permute.xlu0 %163  ;;  %v207_v61 = vadd.f32 %v515_v52, %v511_v54 }
  0x98   : > { %vm168_vm14 = vcmp.eq.s32.totalorder %v164_v22, %v671_v29 }
  0x99   : > { %v211_v19 = vpop.permute.xlu1 %210  ;;  %v512_v63 = vsel %vm168_vm14, 1.0, %v625_v32 }
  0x9a   : > { %vm221_vm5 = vcmp.eq.s32.totalorder %v211_v19, %v671_v29 }
  0x9b   : > { %v517_v42 = vsel %vm221_vm5, 1.0, %v625_v32 }
  0x9c   : > { %v217_v25 = vpop.permute.xlu0 %216  ;;  %v233_v48 = vadd.f32 %v517_v42, %v205_v41 }
  0x9d   : > { %vm223_vm13 = vcmp.eq.s32.totalorder %v217_v25, %v671_v29 }
  0x9e   : > { %v667_v21 = vpop.permute.xlu1 %191  ;;  %v519_v59 = vsel %vm223_vm13, 1.0, %v625_v32 }
  0x9f   : > { %vm196_vm15 = vcmp.eq.s32.totalorder %v667_v21, %v671_v29  ;;  %v235_v3 = vadd.f32 %v519_v59, %v207_v61 }
  0xa0   : > { %v516_v0 = vsel %vm196_vm15, 1.0, %v625_v32 }
  0xa1   : > { %v242_v27 = vpop.permute.xlu0 %241  ;;  %v208_v6 = vadd.f32 %v516_v0, %v512_v63 }
  0xa2   : > { %vm250_vm6 = vcmp.eq.s32.totalorder %v242_v27, %v671_v29 }
  0xa3   : > { %v214_v23 = vpop.permute.xlu1 %213  ;;  %v522_v44 = vsel %vm250_vm6, 1.0, %v625_v32 }
  0xa4   : > { %vm222_vm4 = vcmp.eq.s32.totalorder %v214_v23, %v671_v29 }
  0xa5   : > { %v673_v30 = vpop.permute.xlu0 %247  ;;  %v518_v37 = vsel %vm222_vm4, 1.0, %v625_v32 }
  0xa6   : > { %v234_v43 = vadd.f32 %v518_v37, %v206_v40  ;;  %vm252_vm5 = vcmp.eq.s32.totalorder %v673_v30, %v671_v29 }
  0xa7   : > { %v524_v10 = vsel %vm252_vm5, 1.0, %v625_v32 }
  0xa8   : > { %v239_v24 = vpop.permute.xlu1 %238  ;;  %v262_v50 = vadd.f32 %v522_v44, %v234_v43 }
  0xa9   : > { %vm249_vm7 = vcmp.eq.s32.totalorder %v239_v24, %v671_v29 }
  0xaa   : > { %v273_v38 = vpop.permute.xlu0 %272  ;;  %v521_v47 = vsel %vm249_vm7, 1.0, %v625_v32 }
  0xab   : > { %v261_v53 = vadd.f32 %v521_v47, %v233_v48  ;;  %vm279_vm4 = vcmp.eq.s32.totalorder %v273_v38, %v671_v29 }
  0xac   : > { %v527_v8 = vsel %vm279_vm4, 1.0, %v625_v32 }
  0xad   : > { %v669_v28 = vpop.permute.xlu1 %219 }
  0xae   : > { %vm224_vm3 = vcmp.eq.s32.totalorder %v669_v28, %v671_v29 }
  0xaf   : > { %v298_v46 = vpop.permute.xlu0 %297  ;;  %v520_v5 = vsel %vm224_vm3, 1.0, %v625_v32 }
  0xb0   : > { %vm306_vm12 = vcmp.eq.s32.totalorder %v298_v46, %v671_v29  ;;  %v236_v9 = vadd.f32 %v520_v5, %v208_v6 }
  0xb1   : > { %v530_v58 = vsel %vm306_vm12, 1.0, %v625_v32 }
  0xb2   : > { %v245_v31 = vpop.permute.xlu1 %244  ;;  %v264_v15 = vadd.f32 %v524_v10, %v236_v9 }
  0xb3   : > { %vm251_vm0 = vcmp.eq.s32.totalorder %v245_v31, %v671_v29 }
  0xb4   : > { %v523_v1 = vsel %vm251_vm0, 1.0, %v625_v32 }
  0xb5   : > { %v263_v7 = vadd.f32 %v523_v1, %v235_v3 }
  0xb7   : > { %v267_v39 = vpop.permute.xlu1 %266  ;;  %v291_v12 = vadd.f32 %v527_v8, %v263_v7 }
  0xb8   : > { %vm277_vm8 = vcmp.eq.s32.totalorder %v267_v39, %v671_v29 }
  0xb9   : > { %v525_v51 = vsel %vm277_vm8, 1.0, %v625_v32 }
  0xba   : > { %v289_v57 = vadd.f32 %v525_v51, %v261_v53 }
  0xbb   : > { %v270_v45 = vpop.permute.xlu1 %269 }
  0xbc   : > { %vm278_vm10 = vcmp.eq.s32.totalorder %v270_v45, %v671_v29 }
  0xbd   : > { %v526_v49 = vsel %vm278_vm10, 1.0, %v625_v32 }
  0xbe   : > { %v290_v55 = vadd.f32 %v526_v49, %v262_v50 }
  0xc0   : > { %v295_v56 = vpop.permute.xlu1 %294  ;;  %v318_v2 = vadd.f32 %v530_v58, %v290_v55 }
  0xc1   : > { %vm305_vm1 = vcmp.eq.s32.totalorder %v295_v56, %v671_v29 }
  0xc2   : > { %v529_v60 = vsel %vm305_vm1, 1.0, %v625_v32 }
  0xc3   : > { %v317_v62 = vadd.f32 %v529_v60, %v289_v57 }
  0xc5   : > { %v276_v4 = vpop.permute.xlu1 %275  ;;  %563 = vmatprep.mubr.msk.f32.mxu0 %vm325_vm2, %v317_v62 }
  0xc6   : > { %564 = vmatmul.mubr.msk.f32.vlgmr.msra.gmra.mxu0 %vm325_vm2, %v318_v2  ;;  %vm280_vm6 = vcmp.eq.s32.totalorder %v276_v4, %v671_v29 }
  0xc7   : > { %v528_v13 = vsel %vm280_vm6, 1.0, %v625_v32 }
  0xc8   : > { %v292_v18 = vadd.f32 %v528_v13, %v264_v15 }
  0xca   : > { %v301_v11 = vpop.permute.xlu1 %300 }
  0xcb   : > { %vm307_vm7 = vcmp.eq.s32.totalorder %v301_v11, %v671_v29 }
  0xcc   : > { %v531_v14 = vsel %vm307_vm7, 1.0, %v625_v32 }
  0xcd   : > { %v319_v16 = vadd.f32 %v531_v14, %v291_v12 }
  0xce   : > { %v304_v17 = vpop.permute.xlu1 %303 }
  0xcf   : > { %vm308_vm8 = vcmp.eq.s32.totalorder %v304_v17, %v671_v29  ;;  %566 = vmatprep.mubr.msk.f32.mxu1 %vm325_vm2, %v319_v16 }
  0xd0   : > { %v532_v19 = vsel %vm308_vm8, 1.0, %v625_v32 }
  0xd1   : > { %v320_v20 = vadd.f32 %v532_v19, %v292_v18 }
  0xd3   : > { %567 = vmatmul.mubr.msk.f32.vlgmr.msra.gmra.mxu1 %vm325_vm2, %v320_v20 }
 0x186   : > { %v565_v21 = vpop.f32.mrf.mxu0 }
 0x187   : > { %v544_v24 = vpack.c.bf16 %v565_v21, %v565_v21 }
 0x188   : > { %v404_v22 = vpop.f32.mrf.mxu0 }
 0x189   : > { %v543_v23 = vpack.c.bf16 %v404_v22, %v404_v22  ;;  %441 = vst.msk [vmem:[%s145_s27 + $0x4] sm:$0xf] %vm439_vm9, %v544_v24 }
 0x18b   : > { %440 = vst.msk [vmem:[%s145_s27] sm:$0xf] %vm439_vm9, %v543_v23 }
 0x193   : > { %v568_v25 = vpop.f32.mrf.mxu1 }
 0x194   : > { %v546_v28 = vpack.c.bf16 %v568_v25, %v568_v25 }
 0x195   : > { %v414_v26 = vpop.f32.mrf.mxu1 }
 0x196   : > { %v545_v27 = vpack.c.bf16 %v414_v26, %v414_v26  ;;  %443 = vst.msk [vmem:[%s145_s27 + $0xc] sm:$0xf] %vm439_vm9, %v546_v28 }
 0x198   : > { %442 = vst.msk [vmem:[%s145_s27 + $0x8] sm:$0xf] %vm439_vm9, %v545_v27 }
 0x199 PF: > { %s12_s9 = sadd.s32 1, %s617_s9  }
 0x19a   : > { %p9_p4 = scmp.ge.s32.totalorder %s12_s9, 4  }
 0x19c   :  { %11 = sbr.rel (!%p9_p4) target bundleno = 1 (0x1), region = 58 }

</bundles_post_ra>
